<compile_context>
chip_gen: v5e
topology: v5e:2x2
jax: 0.10.0
libtpu: 0.0.40
codegen_flags: <defaults>
</compile_context>

<pallas_src>
import functools
import math

import jax
import jax.numpy as jnp
from jax.experimental import pallas as pl
from jax.experimental.pallas import tpu as pltpu

LOG_STD_MAX = 2.0
LOG_STD_MIN = -20.0
_HALF_LOG_2PI = 0.5 * math.log(2.0 * math.pi)
_LOG2 = math.log(2.0)


def _actor_kernel(
    obs_ref,                # (TB, obs_dim) f32
    w1_ref, b1_ref,         # (obs_dim, H1) bf16, (1, H1) f32
    w2_ref, b2_ref,         # (H1, H2)     bf16, (1, H2) f32
    wh_ref, bh_ref,         # fused heads: (H2, 2*act_dim) bf16, (1, 2*act_dim) f32
    noise_ref,              # (TB, act_dim) f32
    out_ref,                # (TB, OUT_W) f32  lane-dense slab: [pi | logp | 0-pad]
    *,
    act_dim,
    out_w,
    act_limit,
):
    # ---- MLP trunk: bf16 MXU inputs, f32 accumulation, f32 elementwise ----
    x = obs_ref[...].astype(jnp.bfloat16)
    h = jnp.dot(x, w1_ref[...], preferred_element_type=jnp.float32) + b1_ref[...]
    h = jnp.maximum(h, 0.0).astype(jnp.bfloat16)
    h = jnp.dot(h, w2_ref[...], preferred_element_type=jnp.float32) + b2_ref[...]
    h = jnp.maximum(h, 0.0).astype(jnp.bfloat16)

    # ---- fused mu / log_std head: single matmul, split in-register ----
    heads = jnp.dot(h, wh_ref[...], preferred_element_type=jnp.float32) + bh_ref[...]
    mu = heads[:, :act_dim]
    log_std = jnp.clip(heads[:, act_dim:], LOG_STD_MIN, LOG_STD_MAX)
    std = jnp.exp(log_std)

    # ---- reparameterized sample: a = mu + std * eps ----
    eps = noise_ref[...]
    pi_action = mu + std * eps

    # ---- Normal log-prob, summed over action dim.
    # (a - mu)/std == eps exactly, so no divide/reciprocal is needed.
    log_prob = -0.5 * (eps * eps) - log_std - _HALF_LOG_2PI
    logp_pi = jnp.sum(log_prob, axis=-1, keepdims=True)

    # ---- tanh-squash correction: logp -= sum(2*(log2 - a - softplus(-2a))) ----
    softplus_m2a = jnp.logaddexp(0.0, -2.0 * pi_action)  # softplus(-2a), stable
    corr = 2.0 * (_LOG2 - pi_action - softplus_m2a)
    logp_pi = logp_pi - jnp.sum(corr, axis=-1, keepdims=True)

    # ---- squash + scale, packed lane-dense output (one unmasked full store) ----
    pi = act_limit * jnp.tanh(pi_action)

    pad_w = out_w - (act_dim + 1)
    pieces = [pi, logp_pi]
    if pad_w > 0:
        pieces.append(jnp.zeros((pi.shape[0], pad_w), jnp.float32))
    out_ref[...] = jnp.concatenate(pieces, axis=-1)


def squashed_gaussian_actor_forward(obs, params, noise, act_limit, *, block_b=256):
    """Runs the Pallas kernel. Returns (pi_action (B, act_dim), logp_pi (B,))."""
    B, obs_dim = obs.shape
    act_dim = noise.shape[1]
    h1 = params["w1"].shape[1]
    h2 = params["w2"].shape[1]
    out_w = 128 * pl.cdiv(act_dim + 1, 128)  # lane-dense padded output width

    # Pre-cast weights to bf16 (MXU inputs); keep biases in f32.
    w1 = params["w1"].astype(jnp.bfloat16)
    w2 = params["w2"].astype(jnp.bfloat16)
    # Fuse the mu / log_std heads into one (h2, 2*act_dim) matmul.
    wh = jnp.concatenate([params["wmu"], params["wls"]], axis=1).astype(jnp.bfloat16)
    bh = jnp.concatenate([params["bmu"], params["bls"]], axis=1).astype(jnp.float32)
    b1 = params["b1"].astype(jnp.float32)
    b2 = params["b2"].astype(jnp.float32)

    # Batch tiling: pipeline obs/noise/out over the batch, keep weights resident.
    tb = min(block_b, B)
    if B % tb != 0:
        tb = B  # full-extent block: exempt from the (8,128) divisibility rule
    grid = (B // tb,)

    kernel = functools.partial(
        _actor_kernel, act_dim=act_dim, out_w=out_w, act_limit=float(act_limit)
    )

    out = pl.pallas_call(
        kernel,
        out_shape=jax.ShapeDtypeStruct((B, out_w), jnp.float32),
        grid_spec=pltpu.PrefetchScalarGridSpec(
            num_scalar_prefetch=0,
            grid=grid,
            in_specs=[
                pl.BlockSpec((tb, obs_dim), lambda i: (i, 0)),        # obs (pipelined)
                pl.BlockSpec((obs_dim, h1), lambda i: (0, 0)),        # w1 (resident)
                pl.BlockSpec((1, h1), lambda i: (0, 0)),              # b1
                pl.BlockSpec((h1, h2), lambda i: (0, 0)),             # w2
                pl.BlockSpec((1, h2), lambda i: (0, 0)),              # b2
                pl.BlockSpec((h2, 2 * act_dim), lambda i: (0, 0)),    # fused heads W
                pl.BlockSpec((1, 2 * act_dim), lambda i: (0, 0)),     # fused heads b
                pl.BlockSpec((tb, act_dim), lambda i: (i, 0)),        # noise (pipelined)
            ],
            out_specs=pl.BlockSpec((tb, out_w), lambda i: (i, 0)),
        ),
        compiler_params=pltpu.CompilerParams(
            dimension_semantics=("parallel",),   # v7x: split batch across 2 TCs
        ),
    )(obs, w1, b1, w2, b2, wh, bh, noise)

    pi = out[:, :act_dim]
    logp = out[:, act_dim]
    return pi, logp


def init_params(key, obs_dim, hidden_sizes, act_dim):
    """Deterministic synthetic parameter init (Linear weights stored as (in, out))."""
    sizes = [obs_dim] + list(hidden_sizes)
    keys = jax.random.split(key, 8)
    params = {}
    params["w1"] = jax.random.normal(keys[0], (sizes[0], sizes[1]), jnp.float32) * 0.1
    params["b1"] = jax.random.normal(keys[1], (1, sizes[1]), jnp.float32) * 0.01
    params["w2"] = jax.random.normal(keys[2], (sizes[1], sizes[2]), jnp.float32) * 0.1
    params["b2"] = jax.random.normal(keys[3], (1, sizes[2]), jnp.float32) * 0.01
    params["wmu"] = jax.random.normal(keys[4], (sizes[2], act_dim), jnp.float32) * 0.1
    params["bmu"] = jax.random.normal(keys[5], (1, act_dim), jnp.float32) * 0.01
    params["wls"] = jax.random.normal(keys[6], (sizes[2], act_dim), jnp.float32) * 0.1
    params["bls"] = jax.random.normal(keys[7], (1, act_dim), jnp.float32) * 0.01
    return params


def reference_forward(obs, params, noise, act_limit, dot_dtype=jnp.float32):
    """Pure-JAX reference mirroring the PyTorch forward (deterministic=False,
    with_logprob=True). dot_dtype=jnp.bfloat16 mimics the kernel's MXU casts."""
    def dot(x, w):
        return jnp.dot(x.astype(dot_dtype), w.astype(dot_dtype),
                       preferred_element_type=jnp.float32)

    h = jnp.maximum(dot(obs, params["w1"]) + params["b1"], 0.0)
    h = jnp.maximum(dot(h, params["w2"]) + params["b2"], 0.0)
    mu = dot(h, params["wmu"]) + params["bmu"]
    log_std = jnp.clip(dot(h, params["wls"]) + params["bls"], LOG_STD_MIN, LOG_STD_MAX)
    std = jnp.exp(log_std)
    a = mu + std * noise
    logp = jnp.sum(
        -0.5 * ((a - mu) / std) ** 2 - log_std - _HALF_LOG_2PI, axis=-1
    )
    logp -= jnp.sum(2.0 * (_LOG2 - a - jax.nn.softplus(-2.0 * a)), axis=-1)
    return act_limit * jnp.tanh(a), logp


if __name__ == "__main__":
    key = jax.random.PRNGKey(0)
    k_param, k_obs, k_noise = jax.random.split(key, 3)

    # Small shapes consistent with the module: obs_dim=16, hidden=(32, 32), act_dim=8, batch=8.
    B, obs_dim, act_dim = 8, 16, 8
    hidden_sizes = (32, 32)
    act_limit = 1.5

    params = init_params(k_param, obs_dim, hidden_sizes, act_dim)
    obs = jax.random.normal(k_obs, (B, obs_dim), jnp.float32)
    noise = jax.random.normal(k_noise, (B, act_dim), jnp.float32)  # eps for rsample()

    pi, logp = squashed_gaussian_actor_forward(obs, params, noise, act_limit)
    jax.block_until_ready((pi, logp))

    # Tight check vs. a reference that uses the same bf16 dot inputs as the kernel.
    pi_bf, logp_bf = reference_forward(obs, params, noise, act_limit, dot_dtype=jnp.bfloat16)
    assert jnp.allclose(pi, pi_bf, atol=1e-3, rtol=1e-3)
    assert jnp.allclose(logp, logp_bf, atol=1e-3, rtol=1e-3)

    # Loose semantic sanity check vs. the full-f32 reference (bf16 matmul noise only).
    pi_ref, logp_ref = reference_forward(obs, params, noise, act_limit, dot_dtype=jnp.float32)
    assert jnp.allclose(pi, pi_ref, atol=0.25, rtol=0.05)
    assert jnp.allclose(logp, logp_ref, atol=0.25, rtol=0.05)

    print("KERNEL_OK")
</pallas_src>

<mosaic_0001>
module attributes {stable_mosaic.version = 11 : i64} {
  func.func @_actor_kernel(%arg0: i32, %arg1: memref<8x16xf32, #tpu.memory_space<vmem>>, %arg2: memref<16x32xbf16, #tpu.memory_space<vmem>>, %arg3: memref<1x32xf32, #tpu.memory_space<vmem>>, %arg4: memref<32x32xbf16, #tpu.memory_space<vmem>>, %arg5: memref<1x32xf32, #tpu.memory_space<vmem>>, %arg6: memref<32x16xbf16, #tpu.memory_space<vmem>>, %arg7: memref<1x16xf32, #tpu.memory_space<vmem>>, %arg8: memref<8x8xf32, #tpu.memory_space<vmem>>, %arg9: memref<8x128xf32, #tpu.memory_space<vmem>>) attributes {dimension_semantics = [#tpu.dimension_semantics<parallel>], iteration_bounds = array<i64: 1>, scalar_prefetch = 0 : i64, scratch_operands = 0 : i64, tpu.core_type = #tpu.core_type<tc>, window_params = [{transform_indices = @transform_0, window_bounds = array<i64: 8, 16>}, {pipeline_mode = #tpu.pipeline_mode<synchronous>, transform_indices = @transform_1, window_bounds = array<i64: 16, 32>}, {pipeline_mode = #tpu.pipeline_mode<synchronous>, transform_indices = @transform_2, window_bounds = array<i64: 1, 32>}, {pipeline_mode = #tpu.pipeline_mode<synchronous>, transform_indices = @transform_3, window_bounds = array<i64: 32, 32>}, {pipeline_mode = #tpu.pipeline_mode<synchronous>, transform_indices = @transform_4, window_bounds = array<i64: 1, 32>}, {pipeline_mode = #tpu.pipeline_mode<synchronous>, transform_indices = @transform_5, window_bounds = array<i64: 32, 16>}, {pipeline_mode = #tpu.pipeline_mode<synchronous>, transform_indices = @transform_6, window_bounds = array<i64: 1, 16>}, {transform_indices = @transform_7, window_bounds = array<i64: 8, 8>}, {transform_indices = @transform_8, window_bounds = array<i64: 8, 128>}]} {
    %c0 = arith.constant 0 : index
    %c0_0 = arith.constant 0 : index
    %0 = vector.load %arg1[%c0, %c0_0] : memref<8x16xf32, #tpu.memory_space<vmem>>, vector<8x16xf32>
    %1 = arith.truncf %0 : vector<8x16xf32> to vector<8x16xbf16>
    %c0_1 = arith.constant 0 : index
    %c0_2 = arith.constant 0 : index
    %2 = vector.load %arg2[%c0_1, %c0_2] : memref<16x32xbf16, #tpu.memory_space<vmem>>, vector<16x32xbf16>
    %cst = arith.constant dense<0.000000e+00> : vector<8x32xf32>
    %3 = tpu.matmul %1, %2, %cst {dimension_numbers = #tpu.dot_dimension_numbers<[1], [0], [0], [1], [0, 0, 1, 1], [], []>} : vector<8x16xbf16>, vector<16x32xbf16>, vector<8x32xf32> -> vector<8x32xf32>
    %c0_3 = arith.constant 0 : index
    %c0_4 = arith.constant 0 : index
    %4 = vector.load %arg3[%c0_3, %c0_4] : memref<1x32xf32, #tpu.memory_space<vmem>>, vector<1x32xf32>
    %5 = vector.broadcast %4 : vector<1x32xf32> to vector<8x32xf32>
    %6 = arith.addf %3, %5 : vector<8x32xf32>
    %cst_5 = arith.constant 0.000000e+00 : f32
    %7 = vector.broadcast %cst_5 : f32 to vector<8x32xf32>
    %8 = arith.maximumf %6, %7 : vector<8x32xf32>
    %9 = arith.truncf %8 : vector<8x32xf32> to vector<8x32xbf16>
    %c0_6 = arith.constant 0 : index
    %c0_7 = arith.constant 0 : index
    %10 = vector.load %arg4[%c0_6, %c0_7] : memref<32x32xbf16, #tpu.memory_space<vmem>>, vector<32x32xbf16>
    %cst_8 = arith.constant dense<0.000000e+00> : vector<8x32xf32>
    %11 = tpu.matmul %9, %10, %cst_8 {dimension_numbers = #tpu.dot_dimension_numbers<[1], [0], [0], [1], [0, 0, 1, 1], [], []>} : vector<8x32xbf16>, vector<32x32xbf16>, vector<8x32xf32> -> vector<8x32xf32>
    %c0_9 = arith.constant 0 : index
    %c0_10 = arith.constant 0 : index
    %12 = vector.load %arg5[%c0_9, %c0_10] : memref<1x32xf32, #tpu.memory_space<vmem>>, vector<1x32xf32>
    %13 = vector.broadcast %12 : vector<1x32xf32> to vector<8x32xf32>
    %14 = arith.addf %11, %13 : vector<8x32xf32>
    %cst_11 = arith.constant 0.000000e+00 : f32
    %15 = vector.broadcast %cst_11 : f32 to vector<8x32xf32>
    %16 = arith.maximumf %14, %15 : vector<8x32xf32>
    %17 = arith.truncf %16 : vector<8x32xf32> to vector<8x32xbf16>
    %c0_12 = arith.constant 0 : index
    %c0_13 = arith.constant 0 : index
    %18 = vector.load %arg6[%c0_12, %c0_13] : memref<32x16xbf16, #tpu.memory_space<vmem>>, vector<32x16xbf16>
    %cst_14 = arith.constant dense<0.000000e+00> : vector<8x16xf32>
    %19 = tpu.matmul %17, %18, %cst_14 {dimension_numbers = #tpu.dot_dimension_numbers<[1], [0], [0], [1], [0, 0, 1, 1], [], []>} : vector<8x32xbf16>, vector<32x16xbf16>, vector<8x16xf32> -> vector<8x16xf32>
    %c0_15 = arith.constant 0 : index
    %c0_16 = arith.constant 0 : index
    %20 = vector.load %arg7[%c0_15, %c0_16] : memref<1x16xf32, #tpu.memory_space<vmem>>, vector<1x16xf32>
    %21 = vector.broadcast %20 : vector<1x16xf32> to vector<8x16xf32>
    %22 = arith.addf %19, %21 : vector<8x16xf32>
    %23 = vector.extract_strided_slice %22 {offsets = [0, 0], sizes = [8, 8], strides = [1, 1]} : vector<8x16xf32> to vector<8x8xf32>
    %24 = vector.extract_strided_slice %22 {offsets = [0, 8], sizes = [8, 8], strides = [1, 1]} : vector<8x16xf32> to vector<8x8xf32>
    %cst_17 = arith.constant -2.000000e+01 : f32
    %cst_18 = arith.constant 2.000000e+00 : f32
    %25 = vector.broadcast %cst_17 : f32 to vector<8x8xf32>
    %26 = arith.maximumf %25, %24 : vector<8x8xf32>
    %27 = vector.broadcast %cst_18 : f32 to vector<8x8xf32>
    %28 = arith.minimumf %27, %26 : vector<8x8xf32>
    %29 = math.exp %28 : vector<8x8xf32>
    %c0_19 = arith.constant 0 : index
    %c0_20 = arith.constant 0 : index
    %30 = vector.load %arg8[%c0_19, %c0_20] : memref<8x8xf32, #tpu.memory_space<vmem>>, vector<8x8xf32>
    %31 = arith.mulf %29, %30 : vector<8x8xf32>
    %32 = arith.addf %23, %31 : vector<8x8xf32>
    %33 = arith.mulf %30, %30 : vector<8x8xf32>
    %cst_21 = arith.constant -5.000000e-01 : f32
    %34 = vector.broadcast %cst_21 : f32 to vector<8x8xf32>
    %35 = arith.mulf %34, %33 : vector<8x8xf32>
    %36 = arith.subf %35, %28 : vector<8x8xf32>
    %cst_22 = arith.constant 0.918938517 : f32
    %37 = vector.broadcast %cst_22 : f32 to vector<8x8xf32>
    %38 = arith.subf %36, %37 : vector<8x8xf32>
    %cst_23 = arith.constant dense<0.000000e+00> : vector<8xf32>
    %39 = vector.multi_reduction <add>, %38, %cst_23 [1] : vector<8x8xf32> to vector<8xf32>
    %40 = vector.shape_cast %39 : vector<8xf32> to vector<8x1xf32>
    %cst_24 = arith.constant -2.000000e+00 : f32
    %41 = vector.broadcast %cst_24 : f32 to vector<8x8xf32>
    %42 = arith.mulf %41, %32 : vector<8x8xf32>
    %cst_25 = arith.constant 0.000000e+00 : f32
    %43 = vector.broadcast %cst_25 : f32 to vector<8x8xf32>
    %44 = arith.maximumf %43, %42 : vector<8x8xf32>
    %45 = vector.broadcast %cst_25 : f32 to vector<8x8xf32>
    %46 = arith.subf %45, %42 : vector<8x8xf32>
    %47 = arith.cmpf one, %46, %46 : vector<8x8xf32>
    %48 = vector.broadcast %cst_25 : f32 to vector<8x8xf32>
    %49 = arith.addf %48, %42 : vector<8x8xf32>
    %50 = math.absf %46 : vector<8x8xf32>
    %cst_26 = arith.constant 0.000000e+00 : f32
    %51 = vector.broadcast %cst_26 : f32 to vector<8x8xf32>
    %52 = arith.subf %51, %50 : vector<8x8xf32>
    %53 = math.exp %52 : vector<8x8xf32>
    %54 = math.log1p %53 : vector<8x8xf32>
    %55 = arith.addf %44, %54 : vector<8x8xf32>
    %56 = arith.select %47, %49, %55 : vector<8x8xi1>, vector<8x8xf32>
    %cst_27 = arith.constant 0.693147182 : f32
    %57 = vector.broadcast %cst_27 : f32 to vector<8x8xf32>
    %58 = arith.subf %57, %32 : vector<8x8xf32>
    %59 = arith.subf %58, %56 : vector<8x8xf32>
    %cst_28 = arith.constant 2.000000e+00 : f32
    %60 = vector.broadcast %cst_28 : f32 to vector<8x8xf32>
    %61 = arith.mulf %60, %59 : vector<8x8xf32>
    %cst_29 = arith.constant dense<0.000000e+00> : vector<8xf32>
    %62 = vector.multi_reduction <add>, %61, %cst_29 [1] : vector<8x8xf32> to vector<8xf32>
    %63 = vector.shape_cast %62 : vector<8xf32> to vector<8x1xf32>
    %64 = arith.subf %40, %63 : vector<8x1xf32>
    %65 = math.tanh %32 : vector<8x8xf32>
    %cst_30 = arith.constant 1.500000e+00 : f32
    %66 = vector.broadcast %cst_30 : f32 to vector<8x8xf32>
    %67 = arith.mulf %66, %65 : vector<8x8xf32>
    %cst_31 = arith.constant 0.000000e+00 : f32
    %68 = vector.broadcast %cst_31 : f32 to vector<8x119xf32>
    %69 = tpu.concatenate %67, %64, %68 in 1 : vector<8x8xf32>, vector<8x1xf32>, vector<8x119xf32> -> vector<8x128xf32>
    %c0_32 = arith.constant 0 : index
    %c0_33 = arith.constant 0 : index
    %70 = vector.load %arg9[%c0_32, %c0_33] : memref<8x128xf32, #tpu.memory_space<vmem>>, vector<8x128xf32>
    tpu.vector_store %arg9[%c0_32, %c0_33], %69 {strides = array<i32>} : memref<8x128xf32, #tpu.memory_space<vmem>>, vector<8x128xf32>,
    return
  }
  func.func @transform_0(%arg0: i32) -> (i32, i32) {
    %c0_i32 = arith.constant 0 : i32
    %c0_i32_0 = arith.constant 0 : i32
    return %arg0, %c0_i32 : i32, i32
  }
  func.func @transform_1(%arg0: i32) -> (i32, i32) {
    %c0_i32 = arith.constant 0 : i32
    %c0_i32_0 = arith.constant 0 : i32
    %c0_i32_1 = arith.constant 0 : i32
    return %c0_i32, %c0_i32_0 : i32, i32
  }
  func.func @transform_2(%arg0: i32) -> (i32, i32) {
    %c0_i32 = arith.constant 0 : i32
    %c0_i32_0 = arith.constant 0 : i32
    %c0_i32_1 = arith.constant 0 : i32
    return %c0_i32, %c0_i32_0 : i32, i32
  }
  func.func @transform_3(%arg0: i32) -> (i32, i32) {
    %c0_i32 = arith.constant 0 : i32
    %c0_i32_0 = arith.constant 0 : i32
    %c0_i32_1 = arith.constant 0 : i32
    return %c0_i32, %c0_i32_0 : i32, i32
  }
  func.func @transform_4(%arg0: i32) -> (i32, i32) {
    %c0_i32 = arith.constant 0 : i32
    %c0_i32_0 = arith.constant 0 : i32
    %c0_i32_1 = arith.constant 0 : i32
    return %c0_i32, %c0_i32_0 : i32, i32
  }
  func.func @transform_5(%arg0: i32) -> (i32, i32) {
    %c0_i32 = arith.constant 0 : i32
    %c0_i32_0 = arith.constant 0 : i32
    %c0_i32_1 = arith.constant 0 : i32
    return %c0_i32, %c0_i32_0 : i32, i32
  }
  func.func @transform_6(%arg0: i32) -> (i32, i32) {
    %c0_i32 = arith.constant 0 : i32
    %c0_i32_0 = arith.constant 0 : i32
    %c0_i32_1 = arith.constant 0 : i32
    return %c0_i32, %c0_i32_0 : i32, i32
  }
  func.func @transform_7(%arg0: i32) -> (i32, i32) {
    %c0_i32 = arith.constant 0 : i32
    %c0_i32_0 = arith.constant 0 : i32
    return %arg0, %c0_i32 : i32, i32
  }
  func.func @transform_8(%arg0: i32) -> (i32, i32) {
    %c0_i32 = arith.constant 0 : i32
    %c0_i32_0 = arith.constant 0 : i32
    return %arg0, %c0_i32 : i32, i32
  }
}

</mosaic_0001>

<bundles_post_ra>
// kernel: tpu_custom_call.1
= control target key start
LH: loop header
LB: loop body
LE: loop exit
PB: predicated region body
PF: predicated region fallthrough
CT: control target
= control target key end

     0   :  { %13 = vsyncpa [#allocation3], 0  ;;  %s462_s0 = inlined_call_operand.vmem [shape: f32[8,16], index: 0, kind: input, shape index: {}]   ;;  %s463_s1 = inlined_call_operand.hbm [shape: bf16[16,32], index: 1, kind: input, shape index: {}]   ;;  %s464_s2 = inlined_call_operand.vmem [shape: f32[1,32], index: 2, kind: input, shape index: {}]   ;;  %s465_s3 = inlined_call_operand.vmem [shape: bf16[32,32], index: 3, kind: input, shape index: {}]   ;;  %s466_s4 = inlined_call_operand.vmem [shape: f32[1,32], index: 4, kind: input, shape index: {}]   ;;  %s467_s5 = inlined_call_operand.vmem [shape: bf16[32,16], index: 5, kind: input, shape index: {}]   ;;  %s468_s6 = inlined_call_operand.vmem [shape: f32[1,16], index: 6, kind: input, shape index: {}]   ;;  %s469_s7 = inlined_call_operand.hbm [shape: f32[8,8], index: 7, kind: input, shape index: {}]   ;;  %s470_s8 = inlined_call_operand.hbm [shape: f32[8,128], index: 8, kind: output, shape index: {}]  }
   0x1   :  { %14 = vsyncpa [#allocation6], 0 }
   0x2   :  { %15 = vsyncpa [#allocation4], 0  ;;  %s22_s29 = sshll.u32 %s463_s1, 4  ;;  %s372_s30 = smov [#allocation2]   ;;  %s23_s29 = int_to_ptr.hbm [resolvable:$true] %s22_s29 }
   0x3   :  { %s24_s9 = sshll.u32 %s372_s30, 4  ;;  %s46_s12 = sshll.u32 %s469_s7, 4  ;;  %s25_s9 = int_to_ptr.vmem [resolvable:$true] %s24_s9  ;;  %s47_s12 = int_to_ptr.hbm [resolvable:$true] %s46_s12 }
   0x4   :  { %s373_s13 = smov 64   ;;  %s374_s14 = smov 4  }
   0x5   :  { %30 = dma.hbm_to_vmem [thread:$0]  %s23_s29, 128, %s25_s9, [#allocation3], %s373_s13, %s373_s13, %s374_s14  }
   0x6   :  { %s375_s15 = smov [#allocation5]  }
   0x7   :  { %s48_s16 = sshll.u32 %s375_s15, 4  ;;  %s49_s16 = int_to_ptr.vmem [resolvable:$true] %s48_s16 }
   0x8   :  { %51 = dma.hbm_to_vmem [thread:$0]  %s47_s12, 128, %s49_s16, [#allocation6]  }
   0x9   :  { %366 = dma.done.wait [#allocation3], 128  }
   0xa   :  { %367 = vsyncadd [#allocation3], 4294967168 }
   0xb   :  { %368 = dma.done.wait [#allocation6], 128  }
   0xc   :  { %369 = vsyncadd [#allocation6], 4294967168  ;;  %v271_v0 = vld [vmem:[#allocation2] sm:$0xff]  ;;  %vm75_vm0 = vcmask 130048   ;;  %v273_v3 = vld [vmem:[%s465_s3 + $0x8] sm:$0xff]  ;;  %vm114_vm1 = vcmask 261120  }
   0xd   :  { %v61_v1 = vld [vmem:[%s462_s0] sm:$0xff]  ;;  %86 = vmatpush.bf16.msra.mxu0 %v271_v0  ;;  %124 = vmatpush.bf16.msra.mxu1 %v273_v3  ;;  %v275_v11 = vld [vmem:[%s467_s5 + $0x8] sm:$0xff]  ;;  %vm192_vm2 = vcmask 64512   ;;  %s236_s9 = sshll.u32 %s470_s8, 4  ;;  %vm226_vm5 = vcmask 72704   ;;  %s237_s9 = int_to_ptr.hbm [resolvable:$true] %s236_s9 }
   0xe   :  { %v62_v2 = vpack.c.bf16 %v61_v1, %v61_v1  ;;  %v272_v4 = vld [vmem:[%s465_s3] sm:$0xff]  ;;  %162 = vmatpush.bf16.msra.mxu2 %v275_v11  ;;  %v173_v13 = vld [vmem:[#allocation5] sm:$0xff] }
   0xf   :  { %v283_v5 = vld [vmem:[%s464_s2] ss:$0 sm:$0xff]  ;;  %s376_s2 = smov 8   ;;  %v184_v30 = vmul.f32 %v173_v13, %v173_v13 }
  0x10   :  { %251 = vmatmul.msk.bf16.vlgmr.msra.gmra.mxu0 %vm75_vm0, %v62_v2  ;;  %v274_v12 = vld [vmem:[%s467_s5] sm:$0xff]  ;;  %175 = vrot.lane.b32.xlu0 %v173_v13, %s376_s2  ;;  %s377_s5 = smov 120  }
  0x11   :  { %125 = vmatpush.bf16.msra.mxu1 %v272_v4  ;;  %v284_v14 = vld [vmem:[%s466_s4] ss:$0 sm:$0xff]  ;;  %v185_v31 = vmul.f32 -0.5, %v184_v30  ;;  %s378_s4 = smov [#allocation7]  }
  0x12   :  { %163 = vmatpush.bf16.msra.mxu2 %v274_v12  ;;  %v285_v20 = vld [vmem:[%s468_s6] ss:$0 sm:$0xff]  ;;  %s234_s6 = sshll.u32 %s378_s4, 4  ;;  %s235_s6 = int_to_ptr.vmem [resolvable:$true] %s234_s6 }
  0x82   :  { %v176_v27 = vpop.permute.xlu0 %175 }
  0x8d   :  { %v88_v6 = vpop.f32.mrf.mxu0 }
  0x8e   :  { %v89_v7 = vadd.f32 %v283_v5, %v88_v6 }
  0x90   :  { %v92_v8 = vmax.f32 %v89_v7, 0.0 }
  0x92   :  { %v93_v9 = vpack.c.bf16 %v92_v8, %v92_v8 }
  0x94   :  { %260 = vmatmul.msk.bf16.vlgmr.msra.gmra.mxu1 %vm114_vm1, %v93_v9 }
  0x95   :  { %v90_v10 = vpop.f32.mrf.mxu0 }
 0x111   :  { %v127_v15 = vpop.f32.mrf.mxu1 }
 0x112   :  { %v128_v16 = vadd.f32 %v284_v14, %v127_v15 }
 0x114   :  { %v131_v17 = vmax.f32 %v128_v16, 0.0 }
 0x116   :  { %v132_v18 = vpack.c.bf16 %v131_v17, %v131_v17 }
 0x118   :  { %269 = vmatmul.msk.bf16.vlgmr.msra.gmra.mxu2 %vm114_vm1, %v132_v18 }
 0x119   :  { %v129_v19 = vpop.f32.mrf.mxu1 }
 0x19b   :  { %v165_v21 = vpop.f32.mrf.mxu2 }
 0x19c   :  { %v166_v22 = vadd.f32 %v285_v20, %v165_v21 }
 0x19e   :  { %v169_v23 = vmax.f32 %v166_v22, -20.0 }
 0x1a0   :  { %v170_v24 = vmin.f32 %v169_v23, 2.0 }
 0x1a2   :  { %187 = vrot.lane.b32.xlu1 %v170_v24, %s377_s5  ;;  %v171_v25 = vmul.f32 1.442695, %v170_v24 }
 0x1a3   :  { %v167_v26 = vpop.f32.mrf.mxu2 }
 0x1a4   :  { %286 = vpow2.f32 %v171_v25 }
 0x1aa   :  { %v287_v28 = vpop.eup %286 }
 0x1ab   :  { %v178_v29 = vmul.f32 %v287_v28, %v176_v27 }
 0x1ad   :  { %180 = vrot.lane.b32.xlu0 %v178_v29, %s377_s5 }
 0x214   :  { %v188_v32 = vpop.permute.xlu1 %187 }
 0x215   :  { %v190_v33 = vsub.f32 %v185_v31, %v188_v32 }
 0x217   :  { %v270_v34 = vadd.f32 -0.9189385, %v190_v33 }
 0x219   :  { %v193_v35 = vsel %vm192_vm2, %v270_v34, 0.0 }
 0x21a   :  { %194 = vadd.xlane.f32.xlu1 %v193_v35 }
 0x21f   :  { %v181_v36 = vpop.permute.xlu0 %180 }
 0x220   :  { %v183_v37 = vadd.f32 %v181_v36, %v166_v22 }
 0x222   :  { %v196_v38 = vmul.f32 -2.0, %v183_v37  ;;  %v216_v54 = vsub.f32 0.6931472, %v183_v37 }
 0x224   :  { %v198_v39 = vsub.f32 0.0, %v196_v38  ;;  %v197_v51 = vmax.f32 %v196_v38, 0.0 }
 0x226   :  { %v201_v40 = vand.u32 2147483647, %v198_v39  ;;  %vm199_vm4 = vcmp.ne.f32.partialorder %v198_v39, %v198_v39 }
 0x228   :  { %v202_v41 = vsub.f32 0.0, %v201_v40 }
 0x22a   :  { %v203_v42 = vmul.f32 1.442695, %v202_v41 }
 0x22c   :  { %288 = vpow2.f32 %v203_v42 }
 0x232   :  { %v289_v43 = vpop.eup %288 }
 0x233   :  { %v205_v44 = vadd.f32 1.0, %v289_v43  ;;  %v208_v45 = vmul.f32 -0.5, %v289_v43  ;;  %v211_v47 = vand.u32 2147483647, %v289_v43 }
 0x235   :  { %290 = vlog2.f32 %v205_v44  ;;  %v209_v46 = vadd.f32 1.0, %v208_v45  ;;  %vm212_vm3 = vcmp.lt.f32.partialorder %v211_v47, 0.0004427343 }
 0x236   :  { %292 = vtanh.f32 %v183_v37 }
 0x237   :  { %v210_v50 = vmul.f32 %v289_v43, %v209_v46 }
 0x23b   :  { %v291_v48 = vpop.eup %290 }
 0x23c   :  { %v207_v49 = vmul.f32 0.6931472, %v291_v48  ;;  %v293_v59 = vpop.eup %292 }
 0x23d   :  { %v224_v62 = vmul.f32 1.5, %v293_v59 }
 0x23e   :  { %v213_v52 = vsel %vm212_vm3, %v210_v50, %v207_v49 }
 0x23f   :  { %v214_v53 = vadd.f32 %v213_v52, %v197_v51 }
 0x241   :  { %v215_v55 = vsel %vm199_vm4, %v196_v38, %v214_v53 }
 0x242   :  { %v217_v56 = vsub.f32 %v216_v54, %v215_v55 }
 0x244   :  { %v218_v57 = vmul.f32 2.0, %v217_v56 }
 0x246   :  { %v219_v58 = vsel %vm192_vm2, %v218_v57, 0.0 }
 0x247   :  { %220 = vadd.xlane.f32.xlu2 %v219_v58 }
 0x28d   :  { %v195_v60 = vpop.xlane.xlu1 %194 }
 0x2ba   :  { %v221_v61 = vpop.xlane.xlu2 %220 }
 0x2bb   :  { %v222_v63 = vsub.f32 %v195_v60, %v221_v61 }
 0x2bd   :  { %v225_v0 = vsel %vm192_vm2, %v224_v62, %v222_v63 }
 0x2be   :  { %v227_v1 = vsel %vm226_vm5, %v225_v0, 0.0 }
 0x2bf   :  { %228 = vst [vmem:[#allocation7] sm:$0xff] %v227_v1 }
 0x2c0   :  { %239 = dma.vmem_to_hbm [thread:$0]  %s235_s6, 128, %s237_s9, [#allocation4]  }
 0x2c1   :  { %370 = dma.done.wait [#allocation4], 128  }
 0x2c2   :  { %371 = vsyncadd [#allocation4], 4294967168 }
 0x2c3   :  { %244 = vsyncpa [#allocation3], 1 }
 0x2c4   :  { %245 = vsyncpa [#allocation6], 1 }
 0x2c5   :  { %246 = vsyncpa [#allocation4], 1 }

</bundles_post_ra>
